<compile_context>
chip_gen: v7x
topology: tpu7x:2x2x1
jax: 0.10.0
libtpu: 0.0.40
codegen_flags: <defaults>
</compile_context>

<pallas_src>
import jax
import jax.numpy as jnp
import numpy as np
from jax.experimental import pallas as pl
from jax.experimental.pallas import tpu as pltpu


def _distil_kl_kernel(pos_ref, neg_ref, tpos_ref, tneg_ref,
                      out_pos_ref, out_neg_ref):
    # (TM, P) / (TM, N) row-slabs; softmax math kept in f32 on every generation
    # (astype is a no-op for f32 inputs, allows bf16 inputs to halve HBM bytes).
    sp = pos_ref[...].astype(jnp.float32)
    sn = neg_ref[...].astype(jnp.float32)
    tp = tpos_ref[...].astype(jnp.float32)
    tn = tneg_ref[...].astype(jnp.float32)

    # --- student: log_softmax over the (virtual) concatenated [pos | neg] axis.
    s_max = jnp.maximum(jnp.max(sp, axis=-1, keepdims=True),
                        jnp.max(sn, axis=-1, keepdims=True))
    sp_sh = sp - s_max
    sn_sh = sn - s_max
    s_lse = jnp.log(jnp.sum(jnp.exp(sp_sh), axis=-1, keepdims=True)
                    + jnp.sum(jnp.exp(sn_sh), axis=-1, keepdims=True))
    log_p_pos = sp_sh - s_lse
    log_p_neg = sn_sh - s_lse

    # --- teacher: softmax over the same concatenated axis.
    t_max = jnp.maximum(jnp.max(tp, axis=-1, keepdims=True),
                        jnp.max(tn, axis=-1, keepdims=True))
    tp_sh = tp - t_max
    tn_sh = tn - t_max
    etp = jnp.exp(tp_sh)
    etn = jnp.exp(tn_sh)
    z = (jnp.sum(etp, axis=-1, keepdims=True)
         + jnp.sum(etn, axis=-1, keepdims=True))          # (TM, 1)
    inv_z = 1.0 / z                                       # one divide per row
    log_z = jnp.log(z)
    q_pos = etp * inv_z
    q_neg = etn * inv_z
    log_q_pos = tp_sh - log_z                             # log softmax(teacher)
    log_q_neg = tn_sh - log_z

    # --- KLDivLoss(reduction='none'): q * (log q - log p).  q > 0 always here
    #     (softmax), so torch's target==0 special case never triggers.
    out_pos_ref[...] = (q_pos * (log_q_pos - log_p_pos)).astype(out_pos_ref.dtype)
    out_neg_ref[...] = (q_neg * (log_q_neg - log_p_neg)).astype(out_neg_ref.dtype)


def distil_kl_loss(pos_scores, neg_scores, teacher_pos_scores,
                   teacher_neg_scores, *, block_rows=None):
    """Pallas implementation of DistilKLLoss.forward; returns (B, P + N)."""
    b, p = pos_scores.shape
    bn, n = neg_scores.shape
    assert bn == b
    assert teacher_pos_scores.shape == (b, p)
    assert teacher_neg_scores.shape == (b, n)
    k = p + n
    out_dtype = pos_scores.dtype

    if block_rows is None:
        # 2 pipeline buffers x (4 input + 2 output) row-slabs ~= 6*K f32/row.
        budget_bytes = 8 * 1024 * 1024
        tm = budget_bytes // (2 * 6 * k * 4)
        block_rows = max(8, (tm // 8) * 8)
    block_rows = min(block_rows, b)
    if block_rows < b:
        block_rows = max(8, (block_rows // 8) * 8)        # sublane-aligned tiles

    grid = (pl.cdiv(b, block_rows),)

    def row_map(i):
        return (i, 0)

    out_pos, out_neg = pl.pallas_call(
        _distil_kl_kernel,
        grid=grid,
        in_specs=[
            pl.BlockSpec((block_rows, p), row_map),
            pl.BlockSpec((block_rows, n), row_map),
            pl.BlockSpec((block_rows, p), row_map),
            pl.BlockSpec((block_rows, n), row_map),
        ],
        out_specs=[
            pl.BlockSpec((block_rows, p), row_map),
            pl.BlockSpec((block_rows, n), row_map),
        ],
        out_shape=[
            jax.ShapeDtypeStruct((b, p), out_dtype),
            jax.ShapeDtypeStruct((b, n), out_dtype),
        ],
        compiler_params=pltpu.CompilerParams(
            dimension_semantics=("parallel",),
            vmem_limit_bytes=32 * 1024 * 1024,
        ),
    )(pos_scores, neg_scores, teacher_pos_scores, teacher_neg_scores)

    # torch.cat([pos, neg], dim=1) ordering; pure layout op done in the wrapper.
    return jnp.concatenate([out_pos, out_neg], axis=1)


def _distil_kl_ref(pos, neg, tpos, tneg):
    scores = jnp.concatenate([pos, neg], axis=1)
    log_p = jax.nn.log_softmax(scores, axis=1)
    q = jax.nn.softmax(jnp.concatenate([tpos, tneg], axis=1), axis=1)
    return q * (jnp.log(q) - log_p)      # KLDivLoss(reduction='none')


if __name__ == "__main__":
    key = jax.random.PRNGKey(0)
    k1, k2, k3, k4 = jax.random.split(key, 4)
    B, P, N = 64, 1, 127                 # 1 positive + 127 negatives -> K = 128
    pos = jax.random.normal(k1, (B, P), dtype=jnp.float32)
    neg = jax.random.normal(k2, (B, N), dtype=jnp.float32)
    tpos = jax.random.normal(k3, (B, P), dtype=jnp.float32)
    tneg = jax.random.normal(k4, (B, N), dtype=jnp.float32)

    out = distil_kl_loss(pos, neg, tpos, tneg, block_rows=16)   # grid=(4,)
    jax.block_until_ready(out)

    ref = _distil_kl_ref(pos, neg, tpos, tneg)
    np.testing.assert_allclose(np.asarray(out), np.asarray(ref),
                               rtol=1e-5, atol=1e-6)
    print("KERNEL_OK")
</pallas_src>

<mosaic_0001>
module attributes {stable_mosaic.version = 11 : i64} {
  func.func @_distil_kl_kernel(%arg0: i32, %arg1: memref<16x1xf32, #tpu.memory_space<vmem>>, %arg2: memref<16x127xf32, #tpu.memory_space<vmem>>, %arg3: memref<16x1xf32, #tpu.memory_space<vmem>>, %arg4: memref<16x127xf32, #tpu.memory_space<vmem>>, %arg5: memref<16x1xf32, #tpu.memory_space<vmem>>, %arg6: memref<16x127xf32, #tpu.memory_space<vmem>>) attributes {dimension_semantics = [#tpu.dimension_semantics<parallel>], iteration_bounds = array<i64: 4>, scalar_prefetch = 0 : i64, scratch_operands = 0 : i64, tpu.core_type = #tpu.core_type<tc>, window_params = [{transform_indices = @transform_0, window_bounds = array<i64: 16, 1>}, {transform_indices = @transform_1, window_bounds = array<i64: 16, 127>}, {transform_indices = @transform_2, window_bounds = array<i64: 16, 1>}, {transform_indices = @transform_3, window_bounds = array<i64: 16, 127>}, {transform_indices = @transform_4, window_bounds = array<i64: 16, 1>}, {transform_indices = @transform_5, window_bounds = array<i64: 16, 127>}]} {
    %c0 = arith.constant 0 : index
    %c0_0 = arith.constant 0 : index
    %0 = vector.load %arg1[%c0, %c0_0] : memref<16x1xf32, #tpu.memory_space<vmem>>, vector<16x1xf32>
    %c0_1 = arith.constant 0 : index
    %c0_2 = arith.constant 0 : index
    %1 = vector.load %arg2[%c0_1, %c0_2] : memref<16x127xf32, #tpu.memory_space<vmem>>, vector<16x127xf32>
    %c0_3 = arith.constant 0 : index
    %c0_4 = arith.constant 0 : index
    %2 = vector.load %arg3[%c0_3, %c0_4] : memref<16x1xf32, #tpu.memory_space<vmem>>, vector<16x1xf32>
    %c0_5 = arith.constant 0 : index
    %c0_6 = arith.constant 0 : index
    %3 = vector.load %arg4[%c0_5, %c0_6] : memref<16x127xf32, #tpu.memory_space<vmem>>, vector<16x127xf32>
    %cst = arith.constant dense<0xFF800000> : vector<16xf32>
    %4 = vector.multi_reduction <maximumf>, %0, %cst [1] : vector<16x1xf32> to vector<16xf32>
    %5 = vector.shape_cast %4 : vector<16xf32> to vector<16x1xf32>
    %cst_7 = arith.constant dense<0xFF800000> : vector<16xf32>
    %6 = vector.multi_reduction <maximumf>, %1, %cst_7 [1] : vector<16x127xf32> to vector<16xf32>
    %7 = vector.shape_cast %6 : vector<16xf32> to vector<16x1xf32>
    %8 = arith.maximumf %5, %7 : vector<16x1xf32>
    %9 = arith.subf %0, %8 : vector<16x1xf32>
    %10 = vector.broadcast %8 : vector<16x1xf32> to vector<16x127xf32>
    %11 = arith.subf %1, %10 : vector<16x127xf32>
    %12 = math.exp %9 : vector<16x1xf32>
    %cst_8 = arith.constant dense<0.000000e+00> : vector<16xf32>
    %13 = vector.multi_reduction <add>, %12, %cst_8 [1] : vector<16x1xf32> to vector<16xf32>
    %14 = vector.shape_cast %13 : vector<16xf32> to vector<16x1xf32>
    %15 = math.exp %11 : vector<16x127xf32>
    %cst_9 = arith.constant dense<0.000000e+00> : vector<16xf32>
    %16 = vector.multi_reduction <add>, %15, %cst_9 [1] : vector<16x127xf32> to vector<16xf32>
    %17 = vector.shape_cast %16 : vector<16xf32> to vector<16x1xf32>
    %18 = arith.addf %14, %17 : vector<16x1xf32>
    %19 = math.log %18 : vector<16x1xf32>
    %20 = arith.subf %9, %19 : vector<16x1xf32>
    %21 = vector.broadcast %19 : vector<16x1xf32> to vector<16x127xf32>
    %22 = arith.subf %11, %21 : vector<16x127xf32>
    %cst_10 = arith.constant dense<0xFF800000> : vector<16xf32>
    %23 = vector.multi_reduction <maximumf>, %2, %cst_10 [1] : vector<16x1xf32> to vector<16xf32>
    %24 = vector.shape_cast %23 : vector<16xf32> to vector<16x1xf32>
    %cst_11 = arith.constant dense<0xFF800000> : vector<16xf32>
    %25 = vector.multi_reduction <maximumf>, %3, %cst_11 [1] : vector<16x127xf32> to vector<16xf32>
    %26 = vector.shape_cast %25 : vector<16xf32> to vector<16x1xf32>
    %27 = arith.maximumf %24, %26 : vector<16x1xf32>
    %28 = arith.subf %2, %27 : vector<16x1xf32>
    %29 = vector.broadcast %27 : vector<16x1xf32> to vector<16x127xf32>
    %30 = arith.subf %3, %29 : vector<16x127xf32>
    %31 = math.exp %28 : vector<16x1xf32>
    %32 = math.exp %30 : vector<16x127xf32>
    %cst_12 = arith.constant dense<0.000000e+00> : vector<16xf32>
    %33 = vector.multi_reduction <add>, %31, %cst_12 [1] : vector<16x1xf32> to vector<16xf32>
    %34 = vector.shape_cast %33 : vector<16xf32> to vector<16x1xf32>
    %cst_13 = arith.constant dense<0.000000e+00> : vector<16xf32>
    %35 = vector.multi_reduction <add>, %32, %cst_13 [1] : vector<16x127xf32> to vector<16xf32>
    %36 = vector.shape_cast %35 : vector<16xf32> to vector<16x1xf32>
    %37 = arith.addf %34, %36 : vector<16x1xf32>
    %cst_14 = arith.constant 1.000000e+00 : f32
    %38 = vector.broadcast %cst_14 : f32 to vector<16x1xf32>
    %39 = arith.divf %38, %37 : vector<16x1xf32>
    %40 = math.log %37 : vector<16x1xf32>
    %41 = arith.mulf %31, %39 : vector<16x1xf32>
    %42 = vector.broadcast %39 : vector<16x1xf32> to vector<16x127xf32>
    %43 = arith.mulf %32, %42 : vector<16x127xf32>
    %44 = arith.subf %28, %40 : vector<16x1xf32>
    %45 = vector.broadcast %40 : vector<16x1xf32> to vector<16x127xf32>
    %46 = arith.subf %30, %45 : vector<16x127xf32>
    %47 = arith.subf %44, %20 : vector<16x1xf32>
    %48 = arith.mulf %41, %47 : vector<16x1xf32>
    %c0_15 = arith.constant 0 : index
    %c0_16 = arith.constant 0 : index
    %49 = vector.load %arg5[%c0_15, %c0_16] : memref<16x1xf32, #tpu.memory_space<vmem>>, vector<16x1xf32>
    tpu.vector_store %arg5[%c0_15, %c0_16], %48 {strides = array<i32>} : memref<16x1xf32, #tpu.memory_space<vmem>>, vector<16x1xf32>,
    %50 = arith.subf %46, %22 : vector<16x127xf32>
    %51 = arith.mulf %43, %50 : vector<16x127xf32>
    %c0_17 = arith.constant 0 : index
    %c0_18 = arith.constant 0 : index
    %52 = vector.load %arg6[%c0_17, %c0_18] : memref<16x127xf32, #tpu.memory_space<vmem>>, vector<16x127xf32>
    tpu.vector_store %arg6[%c0_17, %c0_18], %51 {strides = array<i32>} : memref<16x127xf32, #tpu.memory_space<vmem>>, vector<16x127xf32>,
    return
  }
  func.func @transform_0(%arg0: i32) -> (i32, i32) {
    %c0_i32 = arith.constant 0 : i32
    %c0_i32_0 = arith.constant 0 : i32
    return %arg0, %c0_i32 : i32, i32
  }
  func.func @transform_1(%arg0: i32) -> (i32, i32) {
    %c0_i32 = arith.constant 0 : i32
    %c0_i32_0 = arith.constant 0 : i32
    return %arg0, %c0_i32 : i32, i32
  }
  func.func @transform_2(%arg0: i32) -> (i32, i32) {
    %c0_i32 = arith.constant 0 : i32
    %c0_i32_0 = arith.constant 0 : i32
    return %arg0, %c0_i32 : i32, i32
  }
  func.func @transform_3(%arg0: i32) -> (i32, i32) {
    %c0_i32 = arith.constant 0 : i32
    %c0_i32_0 = arith.constant 0 : i32
    return %arg0, %c0_i32 : i32, i32
  }
  func.func @transform_4(%arg0: i32) -> (i32, i32) {
    %c0_i32 = arith.constant 0 : i32
    %c0_i32_0 = arith.constant 0 : i32
    return %arg0, %c0_i32 : i32, i32
  }
  func.func @transform_5(%arg0: i32) -> (i32, i32) {
    %c0_i32 = arith.constant 0 : i32
    %c0_i32_0 = arith.constant 0 : i32
    return %arg0, %c0_i32 : i32, i32
  }
}

</mosaic_0001>

<bundles_post_ra>
// kernel: tpu_custom_call.1
= control target key start
LH: loop header
LB: loop body
LE: loop exit
PB: predicated region body
PF: predicated region fallthrough
CT: control target
= control target key end

     0   :  { %11 = vsyncpa [#allocation3], 0  ;;  %s970_s0 = inlined_call_operand.vmem [shape: f32[64,1], index: 0, kind: input, shape index: {}]   ;;  %s971_s1 = inlined_call_operand.vmem [shape: f32[64,127], index: 1, kind: input, shape index: {}]   ;;  %s972_s2 = inlined_call_operand.vmem [shape: f32[64,1], index: 2, kind: input, shape index: {}]   ;;  %s973_s3 = inlined_call_operand.vmem [shape: f32[64,127], index: 3, kind: input, shape index: {}]   ;;  %s974_s4 = inlined_call_operand.vmem [shape: f32[64,1], index: 4, kind: output, shape index: {0}]   ;;  %s975_s5 = inlined_call_operand.hbm [shape: f32[64,127], index: 5, kind: output, shape index: {1}]  }
   0x1   :  { %13 = vsyncpa [#allocation3 + $0x1], 0  ;;  %s799_s18 = smov 0   ;;  %s801_s19 = smov 0  }
   0x2   :  { %s803_s20 = smov 0   ;;  %s805_s21 = smov 0  }
   0x3 LB: > { %s820_s22 = sadd.s32 4294967295, %s763_s21   ;;  %s608_s23 = sadd.s32 4294967294, %s763_s21   ;;  %s763_s21 = sphi %s805_s21, %s981_s21   ;;  %s759_s20 = sphi %s803_s20, %s980_s20   ;;  %s755_s19 = sphi %s801_s19, %s979_s19   ;;  %s751_s18 = sphi %s799_s18, %s978_s18  }
   0x4   : > { %s824_s24 = sadd.s32 1, %s763_s21   ;;  %s156_s25 = sadd.s32 1, %s759_s20 }
   0x5   : > { %s153_s26 = ssub.s32 %s763_s21, %s824_s24  ;;  %p166_p0 = scmp.ne.s32.totalorder %s759_s20, %s755_s19 }
   0x6   : > { %p154_p1 = scmp.eq.s32.totalorder %s153_s26, 0  ;;  %p167_p2 = scmp.eq.s32.totalorder %s820_s22, 3 }
   0x7   : > { %p172_p3 = scmp.ne.s32.totalorder %s755_s19, %s751_s18  ;;  %p173_p4 = scmp.eq.s32.totalorder %s608_s23, 3 }
   0x8   : > { %s835_s27 = scalar_select %p154_p1, %s759_s20, %s156_s25  }
   0x9   : > { %p837_p5 = por %p167_p2, %p166_p0  ;;  %p841_p6 = por %p173_p4, %p172_p3 }
   0xa   : > { %p611_p7 = scmp.ge.s32.totalorder %s763_s21, 1  ;;  %p227_p8 = scmp.lt.s32.totalorder %s763_s21, 5 }
   0xc   : > { %p228_p9 = pnand %p611_p7, %p227_p8 }
   0xd   : > { %s613_s30 = sshll.u32 (!%p228_p9), %s820_s22, 1  ;;  %vm314_vm0 = vcmask (!%p228_p9), 1039360   ;;  %v765_v8 = vmov (!%p228_p9), 0   ;;  %vm453_vm1 = vcmask (!%p228_p9), 7168   ;;  %s628_s8 = sshll.u32 (!%p228_p9), %s820_s22, 8 }
   0xe   : > { %231 = sbr.rel (%p228_p9) target bundleno = 638 (0x27e), region = 36  ;;  %p276_p10 = scmp.lt.s32.totalorder (!%p228_p9), %s613_s30, 7  ;;  %671 = vset.pattern.permute.xlu0 (!%p228_p9), %v765_v8  ;;  %672 = vset.pattern.permute.xlu1 (!%p228_p9), %v765_v8 }
   0xf   : > { %s924_s13 = scalar_lea.hbm (!%p228_p9), %s975_s5, %s628_s8 }
  0x15   : > { %s983_s30 = smov (!%p276_p10, %s613_s30), 7 }
  0x16   : > { %s848_s6 = sshll.u32 %s983_s30, 3 }
  0x17   : > { %s285_s9 = scalar_lea.vmem %s971_s1, %s848_s6  ;;  %s297_s12 = scalar_lea.vmem %s973_s3, %s848_s6 }
  0x18   : > { %v308_v0 = vld [vmem:[%s285_s9] sm:$0xff]  ;;  %v309_v1 = vld [vmem:[%s285_s9 + $0x8] sm:$0xff]  ;;  %s279_s15 = scalar_lea.vmem %s970_s0, %s848_s6  ;;  %s291_s23 = scalar_lea.vmem %s972_s2, %s848_s6 }
  0x19   : > { %v315_v2 = vsel %vm314_vm0, %v308_v0, -inf  ;;  %v312_v3 = vld [vmem:[%s297_s12] sm:$0xff]  ;;  %v313_v4 = vld [vmem:[%s297_s12 + $0x8] sm:$0xff]  ;;  %v318_v6 = vsel %vm314_vm0, %v309_v1, -inf  ;;  %s303_s30 = scalar_lea.vmem %s974_s4, %s848_s6  ;;  %s272_s6 = sand.u32 1, %s755_s19  }
  0x1a   : > { %316 = vmax.xlane.f32.xlu0 %v315_v2  ;;  %v373_v5 = vsel %vm314_vm0, %v312_v3, -inf  ;;  %v376_v7 = vsel %vm314_vm0, %v313_v4, -inf  ;;  %v306_v9 = vld [vmem:[%s279_s15] sm:$0xff]  ;;  %v307_v14 = vld [vmem:[%s279_s15 + $0x8] sm:$0xff]  ;;  %s612_s7 = sshll.u32 %s272_s6, 4  ;;  %s929_s22 = scalar_lea.sflag [#allocation3], %s272_s6 }
  0x1b   : > { %374 = vmax.xlane.f32.xlu1 %v373_v5  ;;  %v310_v10 = vld [vmem:[%s291_s23] sm:$0xff]  ;;  %v311_v17 = vld [vmem:[%s291_s23 + $0x8] sm:$0xff]  ;;  %s274_s9 = scalar_lea.vmem [#allocation2], %s612_s7  ;;  %s766_s15 = smov [#allocation2]  }
  0x1c   : > { %s485_s10 = sshll.u32 %s274_s9, 4  ;;  %s705_s16 = sshll.u32 %s766_s15, 4  ;;  %s926_s10 = int_to_ptr.vmem [resolvable:$true] %s485_s10  ;;  %s706_s16 = int_to_ptr.vmem [resolvable:$false] %s705_s16 }
  0x1d   : > { %s701_s14 = scalar_lea.vmem %s926_s10, 256  ;;  %s707_s17 = scalar_lea.vmem %s706_s16, 512 }
  0x1e   : > { %319 = vmax.xlane.f32.xlu0 %v318_v6  ;;  %p702_p11 = scmp.ne.s32.totalorder %s926_s10, %s701_s14  ;;  %p708_p0 = scmp.lt.s32.totalorder %s926_s10, %s706_s16 }
  0x1f   : > { %377 = vmax.xlane.f32.xlu1 %v376_v7  ;;  %p709_p1 = scmp.lt.s32.totalorder %s707_s17, %s701_s14 }
  0x20   : > { %p703_p12 = pnand %p702_p11, %p837_p5 }
  0x21   : > { %p710_p2 = por %p709_p1, %p708_p0 }
  0x22   : > { %p704_p13 = pneg %p703_p12 }
  0x24   : > { %p711_p3 = pnand %p710_p2, %p704_p13 }
  0xa7   : > { %v317_v11 = vpop.xlane.xlu0 %316 }
  0xa8   : > { %v321_v12 = vmax.f32 %v306_v9, %v317_v11  ;;  %v375_v13 = vpop.xlane.xlu1 %374 }
  0xa9   : > { %v379_v15 = vmax.f32 %v310_v10, %v375_v13 }
  0xaa   : > { %v870_v16 = vsub.f32 %v306_v9, %v321_v12  ;;  %327 = vperm.xlu0 %671, %v321_v12  }
  0xab   : > { %v320_v18 = vpop.xlane.xlu0 %319  ;;  %v872_v19 = vsub.f32 %v310_v10, %v379_v15 }
  0xac   : > { %v322_v20 = vmax.f32 %v307_v14, %v320_v18  ;;  %v378_v21 = vpop.xlane.xlu1 %377  ;;  %v337_v45 = vmul.f32 1.442695, %v870_v16 }
  0xad   : > { %v380_v22 = vmax.f32 %v311_v17, %v378_v21  ;;  %v395_v47 = vmul.f32 1.442695, %v872_v19 }
  0xae   : > { %v874_v23 = vsub.f32 %v307_v14, %v322_v20  ;;  %332 = vperm.xlu1 %672, %v322_v20  }
  0xaf   : > { %v876_v24 = vsub.f32 %v311_v17, %v380_v22 }
  0xb0   : > { %v339_v46 = vmul.f32 1.442695, %v874_v23 }
  0xb1   : > { %v397_v48 = vmul.f32 1.442695, %v876_v24 }
  0xb2   : > { %385 = vperm.xlu1 %672, %v379_v15  }
  0xb6   : > { %390 = vperm.xlu1 %672, %v380_v22  }
 0x129   : > { %v328_v25 = vpop.permute.xlu0 %327 }
 0x12a   : > { %v878_v26 = vsub.f32 %v308_v0, %v328_v25 }
 0x12c   : > { %v343_v27 = vmul.f32 1.442695, %v878_v26 }
 0x12d   : > { %v333_v28 = vpop.permute.xlu1 %332 }
 0x12e   : > { %673 = vpow2.f32 %v343_v27  ;;  %v881_v29 = vsub.f32 %v309_v1, %v333_v28 }
 0x130   : > { %v345_v30 = vmul.f32 1.442695, %v881_v29 }
 0x131   : > { %v386_v31 = vpop.permute.xlu1 %385 }
 0x132   : > { %675 = vpow2.f32 %v345_v30  ;;  %v884_v32 = vsub.f32 %v312_v3, %v386_v31 }
 0x134   : > { %v399_v33 = vmul.f32 1.442695, %v884_v32 }
 0x135   : > { %v391_v34 = vpop.permute.xlu1 %390 }
 0x136   : > { %677 = vpow2.f32 %v399_v33  ;;  %v887_v35 = vsub.f32 %v313_v4, %v391_v34 }
 0x138   : > { %v674_v36 = vpop.eup %673  ;;  %v401_v37 = vmul.f32 1.442695, %v887_v35 }
 0x139   : > { %v347_v38 = vsel %vm314_vm0, %v674_v36, 0.0 }
 0x13a   : > { %679 = vpow2.f32 %v401_v37  ;;  %348 = vadd.xlane.f32.xlu1 %v347_v38 }
 0x13b   : > { %681 = vpow2.f32 %v337_v45 }
 0x13c   : > { %v676_v39 = vpop.eup %675  ;;  %683 = vpow2.f32 %v339_v46 }
 0x13d   : > { %v350_v40 = vsel %vm314_vm0, %v676_v39, 0.0  ;;  %685 = vpow2.f32 %v395_v47 }
 0x13e   : > { %351 = vadd.xlane.f32.xlu0 %v350_v40  ;;  %687 = vpow2.f32 %v397_v48 }
 0x140   : > { %v892_v41 = vpop.eup %677 }
 0x141   : > { %v405_v42 = vsel %vm314_vm0, %v892_v41, 0.0 }
 0x142   : > { %406 = vadd.xlane.f32.xlu1 %v405_v42 }
 0x144   : > { %v896_v43 = vpop.eup %679 }
 0x145   : > { %v408_v44 = vsel %vm314_vm0, %v896_v43, 0.0  ;;  %v682_v50 = vpop.eup %681 }
 0x146   : > { %409 = vadd.xlane.f32.xlu1 %v408_v44  ;;  %v684_v51 = vpop.eup %683 }
 0x147   : > { %v686_v55 = vpop.eup %685 }
 0x148   : > { %v688_v58 = vpop.eup %687 }
 0x1c7   : > { %v349_v49 = vpop.xlane.xlu1 %348 }
 0x1c8   : > { %v353_v52 = vadd.f32 %v682_v50, %v349_v49 }
 0x1cb   : > { %v352_v53 = vpop.xlane.xlu0 %351 }
 0x1cc   : > { %v354_v54 = vadd.f32 %v684_v51, %v352_v53 }
 0x1ce   : > { %689 = vlog2.f32 %v354_v54 }
 0x1cf   : > { %691 = vlog2.f32 %v353_v52  ;;  %v407_v56 = vpop.xlane.xlu1 %406 }
 0x1d0   : > { %v411_v57 = vadd.f32 %v686_v55, %v407_v56 }
 0x1d2   : > { %693 = vrcp.f32 %v411_v57 }
 0x1d3   : > { %695 = vlog2.f32 %v411_v57  ;;  %v410_v59 = vpop.xlane.xlu1 %409 }
 0x1d4   : > { %v412_v60 = vadd.f32 %v688_v58, %v410_v59 }
 0x1d6   : > { %697 = vrcp.f32 %v412_v60 }
 0x1d7   : > { %699 = vlog2.f32 %v412_v60 }
 0x1d8   : > { %v690_v61 = vpop.eup %689 }
 0x1d9   : > { %v692_v62 = vpop.eup %691  ;;  %v358_v63 = vmul.f32 0.6931472, %v690_v61 }
 0x1da   : > { %v356_v1 = vmul.f32 0.6931472, %v692_v62 }
 0x1db   : > { %368 = vperm.xlu0 %671, %v358_v63   ;;  %v360_v11 = vsub.f32 %v874_v23, %v358_v63 }
 0x1dc   : > { %v694_v0 = vpop.eup %693  ;;  %v359_v5 = vsub.f32 %v870_v16, %v356_v1 }
 0x1dd   : > { %v696_v2 = vpop.eup %695  ;;  %425 = vperm.xlu1 %672, %v694_v0   ;;  %v421_v9 = vmul.f32 %v694_v0, %v686_v55 }
 0x1de   : > { %v418_v3 = vmul.f32 0.6931472, %v696_v2 }
 0x1e0   : > { %v698_v4 = vpop.eup %697  ;;  %v435_v6 = vsub.f32 %v872_v19, %v418_v3 }
 0x1e1   : > { %v700_v7 = vpop.eup %699  ;;  %430 = vperm.xlu1 %672, %v698_v4   ;;  %v422_v14 = vmul.f32 %v698_v4, %v688_v58 }
 0x1e2   : > { %v420_v8 = vmul.f32 0.6931472, %v700_v7  ;;  %v449_v10 = vsub.f32 %v435_v6, %v359_v5 }
 0x1e4   : > { %v436_v12 = vsub.f32 %v876_v24, %v420_v8  ;;  %444 = vperm.xlu0 %671, %v420_v8   ;;  %v451_v13 = vmul.f32 %v449_v10, %v421_v9 }
 0x1e5   : > { %363 = vperm.xlu1 %672, %v356_v1  }
 0x1e6   : > { %v450_v15 = vsub.f32 %v436_v12, %v360_v11  ;;  %454 = vst.msk [vmem:[%s303_s30] sm:$0xff] %vm453_vm1, %v451_v13 }
 0x1e8   : > { %v452_v16 = vmul.f32 %v450_v15, %v422_v14 }
 0x1e9   : > { %439 = vperm.xlu1 %672, %v418_v3  }
 0x1ea   : > { %455 = vst.msk [vmem:[%s303_s30 + $0x8] sm:$0xff] %vm453_vm1, %v452_v16 }
 0x25a   : > { %v369_v18 = vpop.permute.xlu0 %368 }
 0x25b   : > { %v372_v21 = vsub.f32 %v881_v29, %v369_v18 }
 0x25c   : > { %v426_v17 = vpop.permute.xlu1 %425 }
 0x25d   : > { %v433_v29 = vmul.f32 %v892_v41, %v426_v17 }
 0x260   : > { %v431_v19 = vpop.permute.xlu1 %430 }
 0x261   : > { %v434_v24 = vmul.f32 %v896_v43, %v431_v19 }
 0x263   : > { %v445_v20 = vpop.permute.xlu0 %444 }
 0x264   : > { %v448_v22 = vsub.f32 %v887_v35, %v445_v20  ;;  %v364_v23 = vpop.permute.xlu1 %363 }
 0x265   : > { %v371_v30 = vsub.f32 %v878_v26, %v364_v23 }
 0x266   : > { %v457_v25 = vsub.f32 %v448_v22, %v372_v21 }
 0x268   : > { %v459_v27 = vmul.f32 %v457_v25, %v434_v24  ;;  %v440_v28 = vpop.permute.xlu1 %439 }
 0x269   : > { %v447_v31 = vsub.f32 %v884_v32, %v440_v28 }
 0x26a   : > { %461 = vst.msk [vmem:[%s274_s9 + $0x8] sm:$0xff] %vm314_vm0, %v459_v27 }
 0x26b   : > { %v456_v33 = vsub.f32 %v447_v31, %v371_v30 }
 0x26d   : > { %v458_v26 = vmul.f32 %v456_v33, %v433_v29 }
 0x26f   : > { %460 = vst.msk [vmem:[%s274_s9] sm:$0xff] %vm314_vm0, %v458_v26 }
 0x270   : > { %714 = shalt.err (!%p711_p3)
}
 0x271   : > { %s715_s23 = scalar_lea.hbm %s924_s13, 256  ;;  %s719_s30 = scalar_lea.hbm %s975_s5, 1024 }
 0x272   : > { %p716_p4 = scmp.ne.s32.totalorder %s924_s13, %s715_s23  ;;  %p720_p9 = scmp.lt.u32.totalorder %s924_s13, %s975_s5 }
 0x273   : > { %p721_p10 = scmp.lt.u32.totalorder %s719_s30, %s715_s23  ;;  %p723_p12 = scmp.lt.u32.totalorder %s715_s23, %s924_s13 }
 0x274   : > { %p717_p7 = pnand %p716_p4, %p837_p5 }
 0x275   : > { %p722_p11 = por %p721_p10, %p720_p9 }
 0x276   : > { %p718_p8 = pneg %p717_p7 }
 0x277   : > { %p724_p13 = por %p723_p12, %p722_p11 }
 0x279   : > { %p725_p0 = pnand %p724_p13, %p718_p8 }
 0x27b   : > { %728 = shalt.err (!%p725_p0)
}
 0x27c   : > { %s767_s8 = smov 128   ;;  %s768_s9 = smov 8  }
 0x27d   : > { %629 = dma.vmem_to_hbm [thread:$0]  (%p837_p5), %s926_s10, 256, %s924_s13, %s929_s22, %s767_s8, %s767_s8, %s768_s9  }
 0x27e PF: > { %p635_p1 = scmp.ge.s32.totalorder %s763_s21, 2  ;;  %s508_s11 = sand.u32 1, %s751_s18  }
 0x27f   : > { %s509_s12 = scalar_lea.sflag [#allocation3], %s508_s11 }
 0x280   : > { %p632_p2 = pnand %p635_p1, %p841_p6 }
 0x282   : > { %746 = dma.done.wait (!%p632_p2), %s509_s12, 256  }
 0x283   : > { %748 = vsyncadd (!%p632_p2), %s509_s12, 4294967040  ;;  %p16_p3 = scmp.ge.s32.totalorder %s824_s24, 6   ;;  %s978_s18 = smov %s755_s19 }
 0x284   : > { %s979_s19 = smov %s759_s20  ;;  %s980_s20 = smov %s835_s27 }
 0x285   : > { %s981_s21 = smov %s824_s24  ;;  %18 = sbr.rel (!%p16_p3) target bundleno = 3 (0x3), region = 92 }
 0x28c   :  { %514 = vsyncpa [#allocation3], 1 }
 0x28d   :  { %516 = vsyncpa [#allocation3 + $0x1], 1 }

</bundles_post_ra>
